<compile_context>
chip_gen: v6e
topology: v6e:2x2x1
jax: 0.10.0
libtpu: 0.0.40
codegen_flags: <defaults>
</compile_context>

<pallas_src>
import jax
import jax.numpy as jnp
from jax.experimental import pallas as pl
from jax.experimental.pallas import tpu as pltpu


def _round_up(x: int, m: int) -> int:
    return ((x + m - 1) // m) * m


def _patch_embed_kernel(xp_ref, w_ref, b_ref, o_ref):
    # xp_ref: (TM, Kp)  flattened patches tile (bf16 or f32)
    # w_ref:  (Kp, TN)  flattened conv weight tile (bf16 or f32)
    # b_ref:  (1, TN)   bias tile (f32)
    # o_ref:  (TM, TN)  output tile (f32)
    acc = jnp.dot(xp_ref[...], w_ref[...], preferred_element_type=jnp.float32)
    o_ref[...] = (acc + b_ref[...]).astype(o_ref.dtype)


def _pick_tiles(M, Kp, Ep, in_bytes, out_bytes):
    """Pick (TM, TN) so the double-buffered working set fits a ~24 MiB budget."""
    budget = 24 * 1024 * 1024

    # Keep the whole (padded) embed width resident if its (double-buffered)
    # allocation takes at most half the budget; otherwise tile E.
    if 2 * Kp * Ep * in_bytes <= budget // 2:
        TN = Ep
    else:
        TN = next(t for t in (1024, 512, 256, 128) if Ep % t == 0)

    TM = 128
    for tm in (1024, 512, 256, 128):
        ws = (2 * tm * Kp * in_bytes        # xp, double-buffered
              + 2 * Kp * TN * in_bytes      # weight (allocated double-buffered)
              + 2 * TN * 4                  # bias
              + 2 * tm * TN * out_bytes)    # output, double-buffered
        if ws <= budget:
            TM = tm
            break

    if M < TM:
        TM = M                              # full-extent block (any size is legal)
    return TM, TN


def patch_embed(x, weight, bias, kernel_size, use_bf16=True):
    """x: (B, C, H, W) float32 (NCHW, like PyTorch).
    weight: (E, C, kh, kw), bias: (E,).
    Returns: (B, H', W', E) float32 with H' = H // kh, W' = W // kw."""
    B, C, H, W = x.shape
    kh, kw = kernel_size
    E = weight.shape[0]
    Hp, Wp = H // kh, W // kw
    M = B * Hp * Wp
    K = C * kh * kw

    in_dtype = jnp.bfloat16 if use_bf16 else x.dtype
    out_dtype = x.dtype

    # --- im2col: cast first so the materialized (M, K) patch matrix is
    #     half-width in HBM when use_bf16; (c, p, q) column order matches
    #     weight.reshape(E, K).T ---
    xp = x.astype(in_dtype).reshape(B, C, Hp, kh, Wp, kw)
    xp = jnp.transpose(xp, (0, 2, 4, 1, 3, 5)).reshape(M, K)

    w_mat = jnp.transpose(weight.reshape(E, K), (1, 0)).astype(in_dtype)
    b_mat = bias.reshape(1, E).astype(jnp.float32)

    # --- conditional zero-pad of K / E to multiples of 128 (no-op for SAM's
    #     already-aligned 768 / 1024 / 1280) ---
    Kp = _round_up(K, 128)
    Ep = _round_up(E, 128)
    if Kp != K:
        xp = jnp.pad(xp, ((0, 0), (0, Kp - K)))
        w_mat = jnp.pad(w_mat, ((0, Kp - K), (0, 0)))
    if Ep != E:
        w_mat = jnp.pad(w_mat, ((0, 0), (0, Ep - E)))
        b_mat = jnp.pad(b_mat, ((0, 0), (0, Ep - E)))

    in_bytes = jnp.dtype(in_dtype).itemsize
    out_bytes = jnp.dtype(out_dtype).itemsize
    TM, TN = _pick_tiles(M, Kp, Ep, in_bytes, out_bytes)

    # E axis outermost: when TN < Ep the weight block index only changes at
    # outer-axis boundaries, so it is not re-DMA'd across the inner M sweep.
    # When TN == Ep (the common case) weight/bias are resident for the whole
    # grid.  No reduction axis -> no accumulator -> both axes "parallel".
    grid = (Ep // TN, pl.cdiv(M, TM))

    cost = pl.CostEstimate(
        flops=2 * M * Kp * Ep,
        bytes_accessed=(M * Kp * in_bytes          # patches, read once
                        + Kp * Ep * in_bytes       # weight, read once
                        + Ep * 4                   # bias
                        + M * Ep * out_bytes),     # output, written once
        transcendentals=0,
    )

    out = pl.pallas_call(
        _patch_embed_kernel,
        out_shape=jax.ShapeDtypeStruct((M, Ep), out_dtype),
        grid_spec=pltpu.PrefetchScalarGridSpec(
            num_scalar_prefetch=0,
            grid=grid,
            in_specs=[
                pl.BlockSpec((TM, Kp), lambda j, i: (i, 0)),
                pl.BlockSpec((Kp, TN), lambda j, i: (0, j)),
                pl.BlockSpec((1, TN), lambda j, i: (0, j)),
            ],
            out_specs=pl.BlockSpec((TM, TN), lambda j, i: (i, j)),
        ),
        compiler_params=pltpu.CompilerParams(
            dimension_semantics=("parallel", "parallel"),
            # Above v5e's 16 MiB default scope; comfortably under v7x's
            # 64 MiB physical VMEM per TensorCore.
            vmem_limit_bytes=34 * 1024 * 1024,
        ),
        cost_estimate=cost,
    )(xp, w_mat, b_mat)

    if Ep != E:
        out = out[:, :E]   # no-op for 128-aligned embed dims (SAM)
    return out.reshape(B, Hp, Wp, E)


if __name__ == "__main__":
    # Small shapes consistent with the module: in_chans=4, embed_dim=32,
    # kernel_size = stride = (4, 4), padding = (0, 0), image 16x16, batch 2.
    B, C, H, W = 2, 4, 16, 16
    kh, kw = 4, 4
    E = 32

    key = jax.random.PRNGKey(0)
    kx, kw_key, kb_key = jax.random.split(key, 3)

    x = jax.random.normal(kx, (B, C, H, W), dtype=jnp.float32)
    weight = jax.random.normal(kw_key, (E, C, kh, kw), dtype=jnp.float32) * 0.02
    bias = jax.random.normal(kb_key, (E,), dtype=jnp.float32) * 0.02

    patch_embed_jit = jax.jit(patch_embed, static_argnums=(3, 4))

    # Fast path: bf16 matmul inputs, f32 accumulation (default).
    out_bf16 = jax.block_until_ready(patch_embed_jit(x, weight, bias, (kh, kw), True))
    # Exact-parity path: f32 end to end.
    out_f32 = jax.block_until_ready(patch_embed_jit(x, weight, bias, (kh, kw), False))

    # Reference check with plain JAX conv (same semantics as nn.Conv2d).
    ref = jax.lax.conv_general_dilated(
        x, weight, window_strides=(kh, kw), padding="VALID",
        dimension_numbers=("NCHW", "OIHW", "NCHW"),
    ) + bias[None, :, None, None]
    ref = jnp.transpose(ref, (0, 2, 3, 1))

    assert out_bf16.shape == (B, H // kh, W // kw, E)
    assert out_f32.shape == (B, H // kh, W // kw, E)
    assert jnp.allclose(out_f32, ref, atol=1e-4, rtol=1e-4)
    assert jnp.allclose(out_bf16, ref, atol=2e-2, rtol=2e-2)

    print("KERNEL_OK")
</pallas_src>

<mosaic_0001>
module attributes {stable_mosaic.version = 11 : i64} {
  func.func @_patch_embed_kernel(%arg0: i32, %arg1: i32, %arg2: memref<32x128xbf16, #tpu.memory_space<vmem>>, %arg3: memref<128x128xbf16, #tpu.memory_space<vmem>>, %arg4: memref<1x128xf32, #tpu.memory_space<vmem>>, %arg5: memref<32x128xf32, #tpu.memory_space<vmem>>) attributes {dimension_semantics = [#tpu.dimension_semantics<parallel>, #tpu.dimension_semantics<parallel>], iteration_bounds = array<i64: 1, 1>, scalar_prefetch = 0 : i64, scratch_operands = 0 : i64, tpu.core_type = #tpu.core_type<tc>, window_params = [{transform_indices = @transform_0, window_bounds = array<i64: 32, 128>}, {transform_indices = @transform_1, window_bounds = array<i64: 128, 128>}, {transform_indices = @transform_2, window_bounds = array<i64: 1, 128>}, {transform_indices = @transform_3, window_bounds = array<i64: 32, 128>}]} {
    %c0 = arith.constant 0 : index
    %c0_0 = arith.constant 0 : index
    %0 = vector.load %arg2[%c0, %c0_0] : memref<32x128xbf16, #tpu.memory_space<vmem>>, vector<32x128xbf16>
    %c0_1 = arith.constant 0 : index
    %c0_2 = arith.constant 0 : index
    %1 = vector.load %arg3[%c0_1, %c0_2] : memref<128x128xbf16, #tpu.memory_space<vmem>>, vector<128x128xbf16>
    %cst = arith.constant dense<0.000000e+00> : vector<32x128xf32>
    %2 = tpu.matmul %0, %1, %cst {dimension_numbers = #tpu.dot_dimension_numbers<[1], [0], [0], [1], [0, 0, 1, 1], [], []>} : vector<32x128xbf16>, vector<128x128xbf16>, vector<32x128xf32> -> vector<32x128xf32>
    %c0_3 = arith.constant 0 : index
    %c0_4 = arith.constant 0 : index
    %3 = vector.load %arg4[%c0_3, %c0_4] : memref<1x128xf32, #tpu.memory_space<vmem>>, vector<1x128xf32>
    %4 = vector.broadcast %3 : vector<1x128xf32> to vector<32x128xf32>
    %5 = arith.addf %2, %4 : vector<32x128xf32>
    %c0_5 = arith.constant 0 : index
    %c0_6 = arith.constant 0 : index
    %6 = vector.load %arg5[%c0_5, %c0_6] : memref<32x128xf32, #tpu.memory_space<vmem>>, vector<32x128xf32>
    tpu.vector_store %arg5[%c0_5, %c0_6], %5 {strides = array<i32>} : memref<32x128xf32, #tpu.memory_space<vmem>>, vector<32x128xf32>,
    return
  }
  func.func @transform_0(%arg0: i32, %arg1: i32) -> (i32, i32) {
    %c0_i32 = arith.constant 0 : i32
    %c0_i32_0 = arith.constant 0 : i32
    return %arg1, %c0_i32 : i32, i32
  }
  func.func @transform_1(%arg0: i32, %arg1: i32) -> (i32, i32) {
    %c0_i32 = arith.constant 0 : i32
    %c0_i32_0 = arith.constant 0 : i32
    return %c0_i32, %arg0 : i32, i32
  }
  func.func @transform_2(%arg0: i32, %arg1: i32) -> (i32, i32) {
    %c0_i32 = arith.constant 0 : i32
    %c0_i32_0 = arith.constant 0 : i32
    return %c0_i32, %arg0 : i32, i32
  }
  func.func @transform_3(%arg0: i32, %arg1: i32) -> (i32, i32) {
    %c0_i32 = arith.constant 0 : i32
    return %arg1, %arg0 : i32, i32
  }
}

</mosaic_0001>

<bundles_post_ra>
// kernel: patch_embed.1
= control target key start
LH: loop header
LB: loop body
LE: loop exit
PB: predicated region body
PF: predicated region fallthrough
CT: control target
= control target key end

     0   :  { %s307_s0 = inlined_call_operand.vmem [shape: bf16[32,128], index: 0, kind: input, shape index: {}]   ;;  %s308_s1 = inlined_call_operand.vmem [shape: bf16[128,128], index: 1, kind: input, shape index: {}]   ;;  %s309_s2 = inlined_call_operand.vmem [shape: f32[1,128], index: 2, kind: input, shape index: {}]   ;;  %s310_s3 = inlined_call_operand.hbm [shape: f32[32,128], index: 3, kind: output, shape index: {}]  }
   0x1   :  { %v216_v0 = vld [vmem:[%s308_s1 + $0x38] sm:$0xff]   ;;  %v217_v1 = vld [vmem:[%s308_s1 + $0x30] sm:$0xff]   ;;  %v218_v2 = vld [vmem:[%s308_s1 + $0x28] sm:$0xff]  }
   0x2   :  { %193 = vmatprep.subr.bf16.mxu0 %v216_v0  ;;  %v219_v3 = vld [vmem:[%s308_s1 + $0x20] sm:$0xff]  }
   0x3   :  { %194 = vmatpush3.bf16.msra.mxu0 %v216_v0  ;;  %v224_v4 = vld [vmem:[%s307_s0] sm:$0xff]  }
   0x4   :  { %195 = vmatprep.subr.bf16.mxu0 %v217_v1  ;;  %209 = vmatprep.mubr.bf16.mxu0 %v224_v4 }
   0x7   :  { %196 = vmatpush3.bf16.msra.mxu0 %v217_v1 }
   0x8   :  { %197 = vmatprep.subr.bf16.mxu0 %v218_v2 }
   0x9   :  { %8 = vsyncpa [#allocation3], 0  ;;  %v220_v5 = vld [vmem:[%s308_s1 + $0x18] sm:$0xff]   ;;  %v221_v6 = vld [vmem:[%s308_s1 + $0x10] sm:$0xff]   ;;  %s248_s7 = smov [#allocation2]  }
   0xa   :  { %v222_v7 = vld [vmem:[%s308_s1 + $0x8] sm:$0xff]   ;;  %v223_v8 = vld [vmem:[%s308_s1] sm:$0xff]   ;;  %s161_s8 = sshll.u32 %s248_s7, 4  ;;  %s162_s8 = int_to_ptr.vmem [resolvable:$true] %s161_s8 }
   0xb   :  { %198 = vmatpush3.bf16.msra.mxu0 %v218_v2  ;;  %v225_v9 = vld [vmem:[%s307_s0 + $0x8] sm:$0xff]   ;;  %v172_v10 = vld [vmem:[%s309_s2] ss:$0 sm:$0xff]  ;;  %s226_s0 = scalar_lea.vmem %s162_s8, 512  ;;  %p231_p1 = scmp.lt.s32.totalorder %s162_s8, %s162_s8 }
   0xc   :  { %199 = vmatprep.subr.bf16.mxu0 %v219_v3  ;;  %p227_p0 = scmp.ne.s32.totalorder %s162_s8, %s226_s0  ;;  %p232_p2 = scmp.lt.s32.totalorder %s226_s0, %s226_s0 }
   0xe   :  { %p233_p3 = por %p232_p2, %p231_p1 }
   0xf   :  { %200 = vmatpush3.bf16.msra.mxu0 %v219_v3 }
  0x10   :  { %201 = vmatprep.subr.bf16.mxu0 %v220_v5  ;;  %p234_p4 = pnand %p233_p3, %p227_p0 }
  0x13   :  { %202 = vmatpush3.bf16.msra.mxu0 %v220_v5 }
  0x14   :  { %203 = vmatprep.subr.bf16.mxu0 %v221_v6 }
  0x17   :  { %204 = vmatpush3.bf16.msra.mxu0 %v221_v6 }
  0x18   :  { %205 = vmatprep.subr.bf16.mxu0 %v222_v7 }
  0x1b   :  { %206 = vmatpush3.bf16.msra.mxu0 %v222_v7 }
  0x1c   :  { %207 = vmatprep.subr.bf16.mxu0 %v223_v8 }
  0x1f   :  { %208 = vmatpush3.bf16.msra.mxu0 %v223_v8 }
  0x22   :  { %210 = vmatmul.mubr.bf16.vlgmr.msra.gmra.mxu0 %v225_v9 }
  0xe2   :  { %v211_v11 = vpop.f32.mrf.mxu0 }
  0xe3   :  { %v146_v12 = vadd.f32 %v211_v11, %v172_v10 }
  0xe4   :  { %v137_v13 = vpop.f32.mrf.mxu0 }
  0xe5   :  { %154 = vst [vmem:[#allocation2 + $0x10] sm:$0xff] %v146_v12  ;;  %v138_v14 = vadd.f32 %v172_v10, %v137_v13 }
  0xe6   :  { %v212_v15 = vpop.f32.mrf.mxu0 }
  0xe7   :  { %152 = vst [vmem:[#allocation2] sm:$0xff] %v138_v14  ;;  %v149_v16 = vadd.f32 %v212_v15, %v172_v10 }
  0xe8   :  { %v140_v17 = vpop.f32.mrf.mxu0 }
  0xe9   :  { %155 = vst [vmem:[#allocation2 + $0x18] sm:$0xff] %v149_v16  ;;  %v141_v18 = vadd.f32 %v172_v10, %v140_v17 }
  0xeb   :  { %153 = vst [vmem:[#allocation2 + $0x8] sm:$0xff] %v141_v18 }
  0xec   :  { %237 = shalt.err (!%p234_p4)
}
  0xed   :  { %s249_s1 = smov 128   ;;  %s250_s2 = smov 8  }
  0xee   :  { %167 = dma.vmem_to_hbm [thread:$0]  %s162_s8, 512, %s310_s3, [#allocation3], %s249_s1, %s249_s1, %s250_s2  }
  0xef   :  { %246 = dma.done.wait [#allocation3], 512  }
  0xf0   :  { %247 = vsyncadd [#allocation3], 4294966784 }
  0xf1   :  { %171 = vsyncpa [#allocation3], 1 }

</bundles_post_ra>
